<compile_context>
chip_gen: v7x
topology: tpu7x:2x2x1
jax: 0.10.0
libtpu: 0.0.40
codegen_flags: <defaults>
</compile_context>

<pallas_src>
import functools

import jax
import jax.numpy as jnp
from jax.experimental import pallas as pl
from jax.experimental.pallas import tpu as pltpu

_LANE = 128   # lane width (last dim granularity)
_SUB = 8      # sublane granularity for f32 rows


def _round_up(x, m):
    return ((x + m - 1) // m) * m


def _cdiv(a, b):
    return (a + b - 1) // b


def _mlp_kernel(x_ref, w1_ref, b1_ref, w2_ref, b2_ref, w3_ref, b3_ref, o_ref):
    # Fused 3-layer MLP for one batch tile. Matmuls hit the MXU with f32
    # accumulation; biases/ReLU are VPU elementwise in f32. Activations are
    # re-cast to the weight dtype (bf16 or f32) before the next matmul so the
    # MXU always sees matching low-precision operands.
    x = x_ref[...]
    h1 = jnp.dot(x, w1_ref[...], preferred_element_type=jnp.float32) + b1_ref[...]
    h1 = jnp.maximum(h1, 0.0).astype(w2_ref.dtype)
    h2 = jnp.dot(h1, w2_ref[...], preferred_element_type=jnp.float32) + b2_ref[...]
    h2 = jnp.maximum(h2, 0.0).astype(w3_ref.dtype)
    out = jnp.dot(h2, w3_ref[...], preferred_element_type=jnp.float32) + b3_ref[...]
    o_ref[...] = out.astype(o_ref.dtype)


@functools.partial(jax.jit, static_argnames=("block_b", "compute_dtype"))
def fc_nn_forward(x, params, block_b=256, compute_dtype=jnp.bfloat16):
    """x: (B, Ni) f32.  params: dict of w1,b1,w2,b2,w3,b3 (weights as (in, out))."""
    w1, b1 = params["w1"], params["b1"]
    w2, b2 = params["w2"], params["b2"]
    w3, b3 = params["w3"], params["b3"]
    B, Ni = x.shape
    Nh1 = w1.shape[1]
    Nh2 = w2.shape[1]
    No = w3.shape[1]

    # ---- lane-dense padding of all feature dims (exact; zeros contribute nothing) ----
    Ni_p = _round_up(Ni, _LANE)
    Nh1_p = _round_up(Nh1, _LANE)
    Nh2_p = _round_up(Nh2, _LANE)
    No_p = _round_up(No, _LANE)

    cd = compute_dtype
    xp = jnp.pad(x, ((0, 0), (0, Ni_p - Ni))).astype(cd)
    w1p = jnp.pad(w1, ((0, Ni_p - Ni), (0, Nh1_p - Nh1))).astype(cd)
    w2p = jnp.pad(w2, ((0, Nh1_p - Nh1), (0, Nh2_p - Nh2))).astype(cd)
    w3p = jnp.pad(w3, ((0, Nh2_p - Nh2), (0, No_p - No))).astype(cd)
    b1p = jnp.pad(b1, ((0, 0), (0, Nh1_p - Nh1))).astype(jnp.float32)
    b2p = jnp.pad(b2, ((0, 0), (0, Nh2_p - Nh2))).astype(jnp.float32)
    b3p = jnp.pad(b3, ((0, 0), (0, No_p - No))).astype(jnp.float32)

    # ---- batch tiling: big tiles, no divisibility requirement (pad B), grid>=2 when possible ----
    bb = min(block_b, _round_up(B, _SUB))
    bb = max(_round_up(bb, _SUB), _SUB)
    if B > _SUB and _round_up(B, bb) // bb < 2:
        # keep at least 2 grid steps so v7x megacore can shard batch across both TCs
        bb = _round_up(_cdiv(B, 2), _SUB)
    B_pad = _round_up(B, bb)
    grid = (B_pad // bb,)
    xp = jnp.pad(xp, ((0, B_pad - B), (0, 0)))

    # ---- VMEM budget (double-buffered inputs/outputs) & cost estimate ----
    itemsize = jnp.dtype(cd).itemsize
    weight_bytes = itemsize * (Ni_p * Nh1_p + Nh1_p * Nh2_p + Nh2_p * No_p)
    bias_bytes = 4 * (Nh1_p + Nh2_p + No_p)
    io_bytes = itemsize * bb * Ni_p + 4 * bb * No_p
    vmem_needed = 2 * (weight_bytes + bias_bytes + io_bytes)
    vmem_limit = int(min(max(2 * vmem_needed + (4 << 20), 16 << 20), 48 << 20))

    cost = pl.CostEstimate(
        flops=2 * B_pad * (Ni_p * Nh1_p + Nh1_p * Nh2_p + Nh2_p * No_p),
        transcendentals=0,
        bytes_accessed=(B_pad * Ni_p * itemsize + weight_bytes + bias_bytes
                        + B_pad * No_p * 4),
    )

    # Weights/biases are small: replicate the full (padded) tensors to every grid step.
    # With a constant index map the pipeline keeps them resident (no re-DMA between steps).
    # TODO(synk): for very large hidden dims on v7x (64 MiB VMEM), single-buffer the
    # replicated weights (pipeline_mode=pl.Buffered(1)) or DMA them once into scratch.
    def full(shape):
        return pl.BlockSpec(shape, lambda i, _s=shape: (0,) * len(_s))

    out_padded = pl.pallas_call(
        _mlp_kernel,
        out_shape=jax.ShapeDtypeStruct((B_pad, No_p), jnp.float32),
        grid_spec=pltpu.PrefetchScalarGridSpec(
            num_scalar_prefetch=0,
            grid=grid,
            in_specs=[
                pl.BlockSpec((bb, Ni_p), lambda i: (i, 0)),   # x tile
                full((Ni_p, Nh1_p)),
                full((1, Nh1_p)),
                full((Nh1_p, Nh2_p)),
                full((1, Nh2_p)),
                full((Nh2_p, No_p)),
                full((1, No_p)),
            ],
            out_specs=pl.BlockSpec((bb, No_p), lambda i: (i, 0)),
        ),
        compiler_params=pltpu.CompilerParams(
            dimension_semantics=("parallel",),
            vmem_limit_bytes=vmem_limit,
        ),
        cost_estimate=cost,
    )(xp, w1p, b1p, w2p, b2p, w3p, b3p)

    return out_padded[:B, :No]


def init_fc_nn_params(key, Ni, Nh1, Nh2, No=4):
    """Deterministic init mimicking nn.Linear default: U(-1/sqrt(fan_in), 1/sqrt(fan_in)).

    Weights are stored as (in_features, out_features) == PyTorch W.T.
    """
    ks = jax.random.split(key, 6)

    def layer(kw, kb, fan_in, fan_out):
        bound = 1.0 / jnp.sqrt(fan_in)
        w = jax.random.uniform(kw, (fan_in, fan_out), jnp.float32, -bound, bound)
        b = jax.random.uniform(kb, (1, fan_out), jnp.float32, -bound, bound)
        return w, b

    w1, b1 = layer(ks[0], ks[1], Ni, Nh1)
    w2, b2 = layer(ks[2], ks[3], Nh1, Nh2)
    w3, b3 = layer(ks[4], ks[5], Nh2, No)
    return {"w1": w1, "b1": b1, "w2": w2, "b2": b2, "w3": w3, "b3": b3}


def fc_nn_reference(x, params):
    h1 = jnp.maximum(x @ params["w1"] + params["b1"], 0.0)
    h2 = jnp.maximum(h1 @ params["w2"] + params["b2"], 0.0)
    return h2 @ params["w3"] + params["b3"]


if __name__ == "__main__":
    B, Ni, Nh1, Nh2, No = 8, 32, 64, 32, 4

    key = jax.random.PRNGKey(0)
    k_params, k_x = jax.random.split(key)
    params = init_fc_nn_params(k_params, Ni, Nh1, Nh2, No)
    x = jax.random.normal(k_x, (B, Ni), jnp.float32)

    ref = fc_nn_reference(x, params)

    # Exact f32 path: tight check against the pure-JAX reference.
    out_f32 = jax.block_until_ready(
        fc_nn_forward(x, params, block_b=256, compute_dtype=jnp.float32))
    assert out_f32.shape == (B, No), out_f32.shape
    assert jnp.allclose(out_f32, ref, atol=1e-5, rtol=1e-5), "f32 mismatch vs reference"

    # Default perf path (bf16 MXU operands, f32 accumulation): loose check.
    out_bf16 = jax.block_until_ready(fc_nn_forward(x, params))
    assert out_bf16.shape == (B, No), out_bf16.shape
    assert jnp.allclose(out_bf16, ref, atol=1e-1, rtol=1e-1), "bf16 mismatch vs reference"

    print("KERNEL_OK")
</pallas_src>

<mosaic_0001>
module attributes {stable_mosaic.version = 11 : i64} {
  func.func @_mlp_kernel(%arg0: i32, %arg1: memref<8x128xf32, #tpu.memory_space<vmem>>, %arg2: memref<128x128xf32, #tpu.memory_space<vmem>>, %arg3: memref<1x128xf32, #tpu.memory_space<vmem>>, %arg4: memref<128x128xf32, #tpu.memory_space<vmem>>, %arg5: memref<1x128xf32, #tpu.memory_space<vmem>>, %arg6: memref<128x128xf32, #tpu.memory_space<vmem>>, %arg7: memref<1x128xf32, #tpu.memory_space<vmem>>, %arg8: memref<8x128xf32, #tpu.memory_space<vmem>>) attributes {dimension_semantics = [#tpu.dimension_semantics<parallel>], iteration_bounds = array<i64: 1>, scalar_prefetch = 0 : i64, scratch_operands = 0 : i64, tpu.core_type = #tpu.core_type<tc>, window_params = [{transform_indices = @transform_0, window_bounds = array<i64: 8, 128>}, {pipeline_mode = #tpu.pipeline_mode<synchronous>, transform_indices = @transform_1, window_bounds = array<i64: 128, 128>}, {pipeline_mode = #tpu.pipeline_mode<synchronous>, transform_indices = @transform_2, window_bounds = array<i64: 1, 128>}, {pipeline_mode = #tpu.pipeline_mode<synchronous>, transform_indices = @transform_3, window_bounds = array<i64: 128, 128>}, {pipeline_mode = #tpu.pipeline_mode<synchronous>, transform_indices = @transform_4, window_bounds = array<i64: 1, 128>}, {pipeline_mode = #tpu.pipeline_mode<synchronous>, transform_indices = @transform_5, window_bounds = array<i64: 128, 128>}, {pipeline_mode = #tpu.pipeline_mode<synchronous>, transform_indices = @transform_6, window_bounds = array<i64: 1, 128>}, {transform_indices = @transform_7, window_bounds = array<i64: 8, 128>}]} {
    %c0 = arith.constant 0 : index
    %c0_0 = arith.constant 0 : index
    %0 = vector.load %arg1[%c0, %c0_0] : memref<8x128xf32, #tpu.memory_space<vmem>>, vector<8x128xf32>
    %c0_1 = arith.constant 0 : index
    %c0_2 = arith.constant 0 : index
    %1 = vector.load %arg2[%c0_1, %c0_2] : memref<128x128xf32, #tpu.memory_space<vmem>>, vector<128x128xf32>
    %cst = arith.constant dense<0.000000e+00> : vector<8x128xf32>
    %2 = tpu.matmul %0, %1, %cst {dimension_numbers = #tpu.dot_dimension_numbers<[1], [0], [0], [1], [0, 0, 1, 1], [], []>} : vector<8x128xf32>, vector<128x128xf32>, vector<8x128xf32> -> vector<8x128xf32>
    %c0_3 = arith.constant 0 : index
    %c0_4 = arith.constant 0 : index
    %3 = vector.load %arg3[%c0_3, %c0_4] : memref<1x128xf32, #tpu.memory_space<vmem>>, vector<1x128xf32>
    %4 = vector.broadcast %3 : vector<1x128xf32> to vector<8x128xf32>
    %5 = arith.addf %2, %4 : vector<8x128xf32>
    %cst_5 = arith.constant 0.000000e+00 : f32
    %6 = vector.broadcast %cst_5 : f32 to vector<8x128xf32>
    %7 = arith.maximumf %5, %6 : vector<8x128xf32>
    %c0_6 = arith.constant 0 : index
    %c0_7 = arith.constant 0 : index
    %8 = vector.load %arg4[%c0_6, %c0_7] : memref<128x128xf32, #tpu.memory_space<vmem>>, vector<128x128xf32>
    %cst_8 = arith.constant dense<0.000000e+00> : vector<8x128xf32>
    %9 = tpu.matmul %7, %8, %cst_8 {dimension_numbers = #tpu.dot_dimension_numbers<[1], [0], [0], [1], [0, 0, 1, 1], [], []>} : vector<8x128xf32>, vector<128x128xf32>, vector<8x128xf32> -> vector<8x128xf32>
    %c0_9 = arith.constant 0 : index
    %c0_10 = arith.constant 0 : index
    %10 = vector.load %arg5[%c0_9, %c0_10] : memref<1x128xf32, #tpu.memory_space<vmem>>, vector<1x128xf32>
    %11 = vector.broadcast %10 : vector<1x128xf32> to vector<8x128xf32>
    %12 = arith.addf %9, %11 : vector<8x128xf32>
    %cst_11 = arith.constant 0.000000e+00 : f32
    %13 = vector.broadcast %cst_11 : f32 to vector<8x128xf32>
    %14 = arith.maximumf %12, %13 : vector<8x128xf32>
    %c0_12 = arith.constant 0 : index
    %c0_13 = arith.constant 0 : index
    %15 = vector.load %arg6[%c0_12, %c0_13] : memref<128x128xf32, #tpu.memory_space<vmem>>, vector<128x128xf32>
    %cst_14 = arith.constant dense<0.000000e+00> : vector<8x128xf32>
    %16 = tpu.matmul %14, %15, %cst_14 {dimension_numbers = #tpu.dot_dimension_numbers<[1], [0], [0], [1], [0, 0, 1, 1], [], []>} : vector<8x128xf32>, vector<128x128xf32>, vector<8x128xf32> -> vector<8x128xf32>
    %c0_15 = arith.constant 0 : index
    %c0_16 = arith.constant 0 : index
    %17 = vector.load %arg7[%c0_15, %c0_16] : memref<1x128xf32, #tpu.memory_space<vmem>>, vector<1x128xf32>
    %18 = vector.broadcast %17 : vector<1x128xf32> to vector<8x128xf32>
    %19 = arith.addf %16, %18 : vector<8x128xf32>
    %c0_17 = arith.constant 0 : index
    %c0_18 = arith.constant 0 : index
    %20 = vector.load %arg8[%c0_17, %c0_18] : memref<8x128xf32, #tpu.memory_space<vmem>>, vector<8x128xf32>
    tpu.vector_store %arg8[%c0_17, %c0_18], %19 {strides = array<i32>} : memref<8x128xf32, #tpu.memory_space<vmem>>, vector<8x128xf32>,
    return
  }
  func.func @transform_0(%arg0: i32) -> (i32, i32) {
    %c0_i32 = arith.constant 0 : i32
    %c0_i32_0 = arith.constant 0 : i32
    return %arg0, %c0_i32 : i32, i32
  }
  func.func @transform_1(%arg0: i32) -> (i32, i32) {
    %c0_i32 = arith.constant 0 : i32
    %c0_i32_0 = arith.constant 0 : i32
    %c0_i32_1 = arith.constant 0 : i32
    return %c0_i32, %c0_i32_0 : i32, i32
  }
  func.func @transform_2(%arg0: i32) -> (i32, i32) {
    %c0_i32 = arith.constant 0 : i32
    %c0_i32_0 = arith.constant 0 : i32
    %c0_i32_1 = arith.constant 0 : i32
    return %c0_i32, %c0_i32_0 : i32, i32
  }
  func.func @transform_3(%arg0: i32) -> (i32, i32) {
    %c0_i32 = arith.constant 0 : i32
    %c0_i32_0 = arith.constant 0 : i32
    %c0_i32_1 = arith.constant 0 : i32
    return %c0_i32, %c0_i32_0 : i32, i32
  }
  func.func @transform_4(%arg0: i32) -> (i32, i32) {
    %c0_i32 = arith.constant 0 : i32
    %c0_i32_0 = arith.constant 0 : i32
    %c0_i32_1 = arith.constant 0 : i32
    return %c0_i32, %c0_i32_0 : i32, i32
  }
  func.func @transform_5(%arg0: i32) -> (i32, i32) {
    %c0_i32 = arith.constant 0 : i32
    %c0_i32_0 = arith.constant 0 : i32
    %c0_i32_1 = arith.constant 0 : i32
    return %c0_i32, %c0_i32_0 : i32, i32
  }
  func.func @transform_6(%arg0: i32) -> (i32, i32) {
    %c0_i32 = arith.constant 0 : i32
    %c0_i32_0 = arith.constant 0 : i32
    %c0_i32_1 = arith.constant 0 : i32
    return %c0_i32, %c0_i32_0 : i32, i32
  }
  func.func @transform_7(%arg0: i32) -> (i32, i32) {
    %c0_i32 = arith.constant 0 : i32
    %c0_i32_0 = arith.constant 0 : i32
    return %arg0, %c0_i32 : i32, i32
  }
}

</mosaic_0001>

<bundles_post_ra>
// kernel: fc_nn_forward.1
= control target key start
LH: loop header
LB: loop body
LE: loop exit
PB: predicated region body
PF: predicated region fallthrough
CT: control target
= control target key end

     0   :  { %v547_v0 = vmov 0.0|0.0   ;;  %vm548_vm0 = vmmov 0   ;;  %v549_v4 = vmov 0.0   ;;  %s779_s1 = inlined_call_operand.vmem [shape: f32[128,128], index: 1, kind: input, shape index: {}]   ;;  %s780_s3 = inlined_call_operand.vmem [shape: f32[128,128], index: 3, kind: input, shape index: {}]   ;;  %s781_s0 = inlined_call_operand.vmem [shape: f32[8,128], index: 0, kind: input, shape index: {}]   ;;  %s782_s5 = inlined_call_operand.vmem [shape: f32[128,128], index: 5, kind: input, shape index: {}]   ;;  %s783_s2 = inlined_call_operand.vmem [shape: f32[1,128], index: 2, kind: input, shape index: {}]   ;;  %s784_s4 = inlined_call_operand.vmem [shape: f32[1,128], index: 4, kind: input, shape index: {}]   ;;  %s785_s6 = inlined_call_operand.vmem [shape: f32[1,128], index: 6, kind: input, shape index: {}]   ;;  %s786_s7 = inlined_call_operand.vmem [shape: f32[8,128], index: 7, kind: output, shape index: {}]  }
   0x1   :  { %472 = vmatprep.subr.bf16.mxu0 %v547_v0  ;;  %v27_v1 = vld [vmem:[%s779_s1] sm:$0xff]  ;;  %v28_v2 = vld [vmem:[%s779_s1 + $0x8] sm:$0xff]  ;;  %v29_v3 = vld [vmem:[%s779_s1 + $0x10] sm:$0xff]  ;;  %399 = vmatprep.mubr.msk.f32.mxu0 %vm548_vm0, %v549_v4 }
   0x2   :  { %v473_v5 = vpack.c.bf16 %v28_v2, %v27_v1  ;;  %v30_v6 = vld [vmem:[%s779_s1 + $0x18] sm:$0xff]  ;;  %496 = vmatprep.subr.bf16.mxu1 %v547_v0  ;;  %434 = vmatprep.mubr.msk.f32.mxu1 %vm548_vm0, %v549_v4  ;;  %v31_v8 = vld [vmem:[%s779_s1 + $0x20] sm:$0xff]  ;;  %v32_v9 = vld [vmem:[%s779_s1 + $0x28] sm:$0xff] }
   0x3   :  { %v476_v7 = vpack.c.bf16 %v30_v6, %v29_v3  ;;  %v121_v10 = vld [vmem:[%s780_s3] sm:$0xff]  ;;  %v122_v11 = vld [vmem:[%s780_s3 + $0x8] sm:$0xff]  ;;  %v123_v12 = vld [vmem:[%s780_s3 + $0x10] sm:$0xff]  ;;  %v479_v14 = vpack.c.bf16 %v32_v9, %v31_v8 }
   0x4   :  { %474 = vmatpush3.bf16.msra.mxu0 %v473_v5  ;;  %v124_v13 = vld [vmem:[%s780_s3 + $0x18] sm:$0xff]  ;;  %v497_v15 = vpack.c.bf16 %v122_v11, %v121_v10  ;;  %v33_v16 = vld [vmem:[%s779_s1 + $0x30] sm:$0xff]  ;;  %v125_v19 = vld [vmem:[%s780_s3 + $0x20] sm:$0xff] }
   0x5   :  { %475 = vmatprep.subr.bf16.mxu0 %v547_v0  ;;  %v34_v17 = vld [vmem:[%s779_s1 + $0x38] sm:$0xff]  ;;  %v500_v18 = vpack.c.bf16 %v124_v13, %v123_v12  ;;  %v126_v20 = vld [vmem:[%s780_s3 + $0x28] sm:$0xff]  ;;  %v35_v22 = vld [vmem:[%s779_s1 + $0x40] sm:$0xff] }
   0x6   :  { %498 = vmatpush3.bf16.msra.mxu1 %v497_v15  ;;  %v482_v21 = vpack.c.bf16 %v34_v17, %v33_v16  ;;  %v36_v23 = vld [vmem:[%s779_s1 + $0x48] sm:$0xff]  ;;  %v503_v24 = vpack.c.bf16 %v126_v20, %v125_v19  ;;  %v127_v25 = vld [vmem:[%s780_s3 + $0x30] sm:$0xff]  ;;  %v128_v26 = vld [vmem:[%s780_s3 + $0x38] sm:$0xff] }
   0x7   :  { %499 = vmatprep.subr.bf16.mxu1 %v547_v0  ;;  %v485_v27 = vpack.c.bf16 %v36_v23, %v35_v22  ;;  %v37_v28 = vld [vmem:[%s779_s1 + $0x50] sm:$0xff]  ;;  %v38_v29 = vld [vmem:[%s779_s1 + $0x58] sm:$0xff]  ;;  %v506_v30 = vpack.c.bf16 %v128_v26, %v127_v25  ;;  %v129_v31 = vld [vmem:[%s780_s3 + $0x40] sm:$0xff] }
   0x8   :  { %477 = vmatpush3.bf16.msra.mxu0 %v476_v7  ;;  %v130_v32 = vld [vmem:[%s780_s3 + $0x48] sm:$0xff]  ;;  %v488_v33 = vpack.c.bf16 %v38_v29, %v37_v28  ;;  %v39_v34 = vld [vmem:[%s779_s1 + $0x60] sm:$0xff]  ;;  %v131_v37 = vld [vmem:[%s780_s3 + $0x50] sm:$0xff] }
   0x9   :  { %478 = vmatprep.subr.bf16.mxu0 %v547_v0  ;;  %v40_v35 = vld [vmem:[%s779_s1 + $0x68] sm:$0xff]  ;;  %v509_v36 = vpack.c.bf16 %v130_v32, %v129_v31  ;;  %v132_v38 = vld [vmem:[%s780_s3 + $0x58] sm:$0xff]  ;;  %v41_v40 = vld [vmem:[%s779_s1 + $0x70] sm:$0xff] }
   0xa   :  { %501 = vmatpush3.bf16.msra.mxu1 %v500_v18  ;;  %v491_v39 = vpack.c.bf16 %v40_v35, %v39_v34  ;;  %v42_v41 = vld [vmem:[%s779_s1 + $0x78] sm:$0xff]  ;;  %v512_v42 = vpack.c.bf16 %v132_v38, %v131_v37  ;;  %v133_v43 = vld [vmem:[%s780_s3 + $0x60] sm:$0xff]  ;;  %v134_v44 = vld [vmem:[%s780_s3 + $0x68] sm:$0xff] }
   0xb   :  { %502 = vmatprep.subr.bf16.mxu1 %v547_v0  ;;  %v494_v45 = vpack.c.bf16 %v42_v41, %v41_v40  ;;  %v515_v46 = vpack.c.bf16 %v134_v44, %v133_v43  ;;  %v26_v47 = vld [vmem:[%s781_s0] sm:$0xff]  ;;  %v135_v48 = vld [vmem:[%s780_s3 + $0x70] sm:$0xff]  ;;  %v136_v49 = vld [vmem:[%s780_s3 + $0x78] sm:$0xff] }
   0xc   :  { %480 = vmatpush3.bf16.msra.mxu0 %v479_v14  ;;  %v518_v50 = vpack.c.bf16 %v136_v49, %v135_v48  ;;  %v215_v51 = vld [vmem:[%s782_s5] sm:$0xff]  ;;  %v216_v52 = vld [vmem:[%s782_s5 + $0x8] sm:$0xff]  ;;  %v217_v53 = vld [vmem:[%s782_s5 + $0x10] sm:$0xff] }
   0xd   :  { %481 = vmatprep.subr.bf16.mxu0 %v547_v0  ;;  %v521_v54 = vpack.c.bf16 %v216_v52, %v215_v51  ;;  %v218_v55 = vld [vmem:[%s782_s5 + $0x18] sm:$0xff]  ;;  %v219_v57 = vld [vmem:[%s782_s5 + $0x20] sm:$0xff]  ;;  %v220_v58 = vld [vmem:[%s782_s5 + $0x28] sm:$0xff] }
   0xe   :  { %504 = vmatpush3.bf16.msra.mxu1 %v503_v24  ;;  %v524_v56 = vpack.c.bf16 %v218_v55, %v217_v53  ;;  %v527_v59 = vpack.c.bf16 %v220_v58, %v219_v57  ;;  %v221_v60 = vld [vmem:[%s782_s5 + $0x30] sm:$0xff]  ;;  %v222_v61 = vld [vmem:[%s782_s5 + $0x38] sm:$0xff]  ;;  %v223_v63 = vld [vmem:[%s782_s5 + $0x40] sm:$0xff] }
   0xf   :  { %505 = vmatprep.subr.bf16.mxu1 %v547_v0  ;;  %v530_v62 = vpack.c.bf16 %v222_v61, %v221_v60  ;;  %v224_v1 = vld [vmem:[%s782_s5 + $0x48] sm:$0xff]  ;;  %v225_v3 = vld [vmem:[%s782_s5 + $0x50] sm:$0xff]  ;;  %v227_v6 = vld [vmem:[%s782_s5 + $0x60] sm:$0xff] }
  0x10   :  { %483 = vmatpush3.bf16.msra.mxu0 %v482_v21  ;;  %v533_v2 = vpack.c.bf16 %v224_v1, %v223_v63  ;;  %v228_v7 = vld [vmem:[%s782_s5 + $0x68] sm:$0xff]  ;;  %v313_v9 = vld [vmem:[%s783_s2] ss:$0 sm:$0xff]  ;;  %v229_v14 = vld [vmem:[%s782_s5 + $0x70] sm:$0xff] }
  0x11   :  { %484 = vmatprep.subr.bf16.mxu0 %v547_v0  ;;  %v539_v8 = vpack.c.bf16 %v228_v7, %v227_v6  ;;  %v230_v15 = vld [vmem:[%s782_s5 + $0x78] sm:$0xff]  ;;  %v315_v21 = vld [vmem:[%s785_s6] ss:$0 sm:$0xff] }
  0x12   :  { %507 = vmatpush3.bf16.msra.mxu1 %v506_v30  ;;  %v542_v16 = vpack.c.bf16 %v230_v15, %v229_v14 }
  0x13   :  { %508 = vmatprep.subr.bf16.mxu1 %v547_v0 }
  0x14   :  { %486 = vmatpush3.bf16.msra.mxu0 %v485_v27 }
  0x15   :  { %487 = vmatprep.subr.bf16.mxu0 %v547_v0 }
  0x16   :  { %510 = vmatpush3.bf16.msra.mxu1 %v509_v36 }
  0x17   :  { %511 = vmatprep.subr.bf16.mxu1 %v547_v0 }
  0x18   :  { %489 = vmatpush3.bf16.msra.mxu0 %v488_v33 }
  0x19   :  { %490 = vmatprep.subr.bf16.mxu0 %v547_v0 }
  0x1a   :  { %513 = vmatpush3.bf16.msra.mxu1 %v512_v42 }
  0x1b   :  { %514 = vmatprep.subr.bf16.mxu1 %v547_v0 }
  0x1c   :  { %492 = vmatpush3.bf16.msra.mxu0 %v491_v39 }
  0x1d   :  { %493 = vmatprep.subr.bf16.mxu0 %v547_v0 }
  0x1e   :  { %516 = vmatpush3.bf16.msra.mxu1 %v515_v46 }
  0x1f   :  { %517 = vmatprep.subr.bf16.mxu1 %v547_v0 }
  0x20   :  { %495 = vmatpush3.bf16.msra.mxu0 %v494_v45 }
  0x21   :  { %520 = vmatprep.subr.bf16.mxu0 %v547_v0 }
  0x22   :  { %519 = vmatpush3.bf16.msra.mxu1 %v518_v50 }
  0x23   :  { %400 = vmatmul.mubr.f32.vlgmr.msra.gmra.mrb[0].mxu0 %v26_v47 }
  0x24   :  { %469 = vmatprep.mubr.msk.f32.mxu0 %vm548_vm0, %v549_v4  ;;  %522 = vmatpush3.bf16.msra.mxu0 %v521_v54  ;;  %v226_v4 = vld [vmem:[%s782_s5 + $0x58] sm:$0xff] }
  0x25   :  { %523 = vmatprep.subr.bf16.mxu0 %v547_v0  ;;  %v536_v5 = vpack.c.bf16 %v226_v4, %v225_v3 }
  0x28   :  { %525 = vmatpush3.bf16.msra.mxu0 %v524_v56 }
  0x29   :  { %526 = vmatprep.subr.bf16.mxu0 %v547_v0 }
  0x2c   :  { %528 = vmatpush3.bf16.msra.mxu0 %v527_v59 }
  0x2d   :  { %529 = vmatprep.subr.bf16.mxu0 %v547_v0 }
  0x30   :  { %531 = vmatpush3.bf16.msra.mxu0 %v530_v62 }
  0x31   :  { %532 = vmatprep.subr.bf16.mxu0 %v547_v0 }
  0x34   :  { %534 = vmatpush3.bf16.msra.mxu0 %v533_v2 }
  0x35   :  { %535 = vmatprep.subr.bf16.mxu0 %v547_v0 }
  0x38   :  { %537 = vmatpush3.bf16.msra.mxu0 %v536_v5 }
  0x39   :  { %538 = vmatprep.subr.bf16.mxu0 %v547_v0 }
  0x3c   :  { %540 = vmatpush3.bf16.msra.mxu0 %v539_v8 }
  0x3d   :  { %541 = vmatprep.subr.bf16.mxu0 %v547_v0  ;;  %v314_v0 = vld [vmem:[%s784_s4] ss:$0 sm:$0xff] }
  0x40   :  { %543 = vmatpush3.bf16.msra.mxu0 %v542_v16 }
  0xf6   :  { %v116_v10 = vpop.f32.mrb[0].mxu0 }
  0xf7   :  { %v117_v11 = vadd.f32 %v313_v9, %v116_v10  ;;  %v401_v12 = vpop.f32.mrb[1].mxu0 }
  0xf9   :  { %v120_v13 = vmax.f32 %v117_v11, 0.0 }
  0xfb   :  { %435 = vmatmul.mubr.f32.vlgmr.msra.gmra.mrb[0].mxu1 %v120_v13 }
 0x1ce   :  { %v210_v17 = vpop.f32.mrb[0].mxu1 }
 0x1cf   :  { %v211_v18 = vadd.f32 %v314_v0, %v210_v17  ;;  %v436_v19 = vpop.f32.mrb[1].mxu1 }
 0x1d1   :  { %v214_v20 = vmax.f32 %v211_v18, 0.0 }
 0x1d3   :  { %470 = vmatmul.mubr.f32.vlgmr.msra.gmra.mrb[2].mxu0 %v214_v20 }
 0x2a6   :  { %v304_v22 = vpop.f32.mrb[2].mxu0 }
 0x2a7   :  { %v305_v23 = vadd.f32 %v315_v21, %v304_v22  ;;  %v471_v24 = vpop.f32.mrb[3].mxu0 }
 0x2a9   :  { %308 = vst [vmem:[%s786_s7] sm:$0xff] %v305_v23 }

</bundles_post_ra>
